<compile_context>
chip_gen: v5e
topology: v5e:2x2
jax: 0.10.0
libtpu: 0.0.40
codegen_flags: <defaults>
</compile_context>

<pallas_src>
import functools

import jax
import jax.numpy as jnp
from jax.experimental import pallas as pl
from jax.experimental.pallas import tpu as pltpu


def _round_up(x, m):
    return ((x + m - 1) // m) * m


def _irm_penalty_kernel(y_ref, labels_ref, out_ref, acc_even_ref, acc_all_ref,
                        *, n_rows):
    # y_ref: (TN, C) logits tile (full class dim, no padding)
    # labels_ref: (TN, 1) int32
    # out_ref: (1, 8, 128) f32 per-core partials block (resident across the
    #          inner reduction axis): [0,0,:]=sum_even, [0,1,:]=sum_odd
    # acc_*_ref: (TN, 1) f32 VMEM scratch, persist across grid steps
    c = pl.program_id(0)            # core-split axis ("parallel")
    i = pl.program_id(1)            # batch-tile axis ("arbitrary" reduction)
    steps = pl.num_programs(1)

    @pl.when(i == 0)
    def _init():
        acc_even_ref[...] = jnp.zeros_like(acc_even_ref)
        acc_all_ref[...] = jnp.zeros_like(acc_all_ref)

    y = y_ref[...].astype(jnp.float32)      # (TN, C); upcast in-register (bf16 OK)
    labels = labels_ref[...]                # (TN, 1) int32
    tn, cc = y.shape

    # per-row d/ds CE(s*y_i, l_i) at s=1 = sum_c softmax(y_i)_c * y_ic - y_{i,l_i}
    col = jax.lax.broadcasted_iota(jnp.int32, (tn, cc), 1)
    picked = jnp.sum(jnp.where(col == labels, y, 0.0), axis=-1, keepdims=True)
    m = jnp.max(y, axis=-1, keepdims=True)
    e = jnp.exp(y - m)
    denom = jnp.sum(e, axis=-1, keepdims=True)
    se_y = jnp.sum(e * y, axis=-1, keepdims=True)
    g = se_y / denom - picked               # (TN, 1); exact reciprocal (review)

    # Mask batch-tail / ghost-tile rows.  Row-wise reductions mean garbage in
    # out-of-bounds rows cannot contaminate valid rows; just zero their g.
    # `offset` uses the UNCLAMPED logical tile index (the index_map clamps the
    # DMA so ghost tiles re-read a valid tile, but they must contribute 0).
    row = jax.lax.broadcasted_iota(jnp.int32, (tn, 1), 0)
    offset = (c * steps + i) * tn
    g = jnp.where(offset + row < n_rows, g, 0.0)

    # Even/odd environment split. offset is even (tn % 8 == 0) so local parity
    # equals global parity. sum_odd is recovered as sum_all - sum_even.
    acc_even_ref[...] += jnp.where(row % 2 == 0, g, 0.0)
    acc_all_ref[...] += g

    @pl.when(i == steps - 1)
    def _finalize():
        s_even = jnp.sum(acc_even_ref[...])
        s_odd = jnp.sum(acc_all_ref[...]) - s_even
        sub = jax.lax.broadcasted_iota(jnp.int32, out_ref.shape, 1)
        out_ref[...] = jnp.where(sub == 0, s_even,
                                 jnp.where(sub == 1, s_odd, 0.0))


def invariance_penalty_loss(y, labels, *, tile_rows=None):
    """y: (N, C) float logits (f32 or bf16), labels: (N,) int — scalar f32 penalty."""
    n, c = y.shape
    assert n % 2 == 0, "need an even batch so even/odd splits are equal-sized"

    itemsize = jnp.dtype(y.dtype).itemsize
    cp128 = _round_up(c, 128)  # physical lane width of in-kernel f32 temporaries

    # ---- VMEM budget / tile sizing -----------------------------------------
    try:
        vmem_cap = int(pltpu.get_tpu_info().vmem_capacity_bytes)
    except Exception:
        vmem_cap = 64 * 1024 * 1024
    # v7x (64 MiB physical) -> ~40 MiB scoped; v5e/v6e (128 MiB) -> 80 MiB.
    vmem_limit = min((vmem_cap * 5) // 8, 80 * 1024 * 1024)

    if tile_rows is None:
        usable = vmem_limit - 2 * 1024 * 1024
        # double-buffered logits tile + labels + ~5 full-tile f32 temporaries
        per_row = 2 * c * itemsize + 2 * 4 + 5 * cp128 * 4
        tn = usable // per_row
        tn = max(8, min(4096, (tn // 8) * 8))
    else:
        tn = max(8, _round_up(tile_rows, 8))
    tn = min(tn, _round_up(n, 8))

    n_tiles = (n + tn - 1) // tn
    num_splits = 2 if n_tiles >= 2 else 1            # megacore split (v7x: 2 TCs)
    steps = (n_tiles + num_splits - 1) // num_splits
    last_tile = n_tiles - 1

    labels2d = labels.reshape(n, 1).astype(jnp.int32)

    kernel = functools.partial(_irm_penalty_kernel, n_rows=n)

    # Clamp the block index so ghost tiles (when num_splits*steps > n_tiles)
    # re-read the last valid tile instead of DMA-ing out of bounds; the
    # in-kernel row mask zeroes their contribution.
    def tile_map(ci, ii, steps=steps, last=last_tile):
        return (jnp.minimum(ci * steps + ii, last), 0)

    cost = pl.CostEstimate(
        flops=8 * n * cp128,
        transcendentals=n * cp128,
        bytes_accessed=itemsize * n * c + 4 * n + num_splits * 8 * 128 * 4,
    )

    partials = pl.pallas_call(
        kernel,
        out_shape=jax.ShapeDtypeStruct((num_splits, 8, 128), jnp.float32),
        grid_spec=pltpu.PrefetchScalarGridSpec(
            num_scalar_prefetch=0,
            grid=(num_splits, steps),
            in_specs=[
                pl.BlockSpec((tn, c), tile_map),   # full class dim -> no pad copy
                pl.BlockSpec((tn, 1), tile_map),
            ],
            out_specs=pl.BlockSpec((1, 8, 128), lambda ci, ii: (ci, 0, 0)),
            scratch_shapes=[
                pltpu.VMEM((tn, 1), jnp.float32),  # sum_even accumulator
                pltpu.VMEM((tn, 1), jnp.float32),  # sum_all accumulator
            ],
        ),
        compiler_params=pltpu.CompilerParams(
            dimension_semantics=("parallel", "arbitrary"),
            vmem_limit_bytes=int(vmem_limit),
        ),
        cost_estimate=cost,
    )(y, labels2d)

    inv = jnp.float32(1.0 / (n // 2))
    sum_even = jnp.sum(partials[:, 0, 0])
    sum_odd = jnp.sum(partials[:, 1, 0])
    return (sum_even * inv) * (sum_odd * inv)


def _reference(y, labels):
    """Pure-JAX reference: autodiff w.r.t. scale, mirroring the torch module."""
    def ce(scale, logits, lbl):
        z = logits.astype(jnp.float32) * scale
        lse = jax.scipy.special.logsumexp(z, axis=-1)
        picked = jnp.take_along_axis(z, lbl[:, None], axis=-1)[:, 0]
        return jnp.mean(lse - picked)

    g1 = jax.grad(ce)(jnp.float32(1.0), y[0::2], labels[0::2])
    g2 = jax.grad(ce)(jnp.float32(1.0), y[1::2], labels[1::2])
    return g1 * g2


if __name__ == "__main__":
    key = jax.random.PRNGKey(0)
    k1, k2, k3, k4 = jax.random.split(key, 4)

    # Test 1: small single-tile case; C=32 stays unpadded (full-dim BlockSpec).
    N, C = 8, 32
    y = jax.random.normal(k1, (N, C), dtype=jnp.float32)
    labels = jax.random.randint(k2, (N,), 0, C, dtype=jnp.int32)
    penalty = invariance_penalty_loss(y, labels)
    jax.block_until_ready(penalty)
    ref = _reference(y, labels)
    assert jnp.allclose(penalty, ref, rtol=5e-3, atol=1e-3), (penalty, ref)

    # Test 2: multi-tile reduction with 2-way core split, a partial last tile
    # (56 rows, 16-row tiles) — exercises edge-block DMA + in-kernel row mask.
    N2, C2 = 56, 48
    y2 = jax.random.normal(k3, (N2, C2), dtype=jnp.float32)
    labels2 = jax.random.randint(k4, (N2,), 0, C2, dtype=jnp.int32)
    penalty2 = invariance_penalty_loss(y2, labels2, tile_rows=16)
    jax.block_until_ready(penalty2)
    ref2 = _reference(y2, labels2)
    assert jnp.allclose(penalty2, ref2, rtol=5e-3, atol=1e-3), (penalty2, ref2)

    # Test 3: bf16 logits fed straight through (halves HBM traffic; f32 math in-kernel).
    y_bf16 = y.astype(jnp.bfloat16)
    penalty3 = invariance_penalty_loss(y_bf16, labels)
    jax.block_until_ready(penalty3)
    ref3 = _reference(y_bf16.astype(jnp.float32), labels)
    assert jnp.allclose(penalty3, ref3, rtol=1e-2, atol=1e-3), (penalty3, ref3)

    print("KERNEL_OK")
</pallas_src>

<mosaic_0001>
module attributes {stable_mosaic.version = 11 : i64} {
  func.func @_irm_penalty_kernel(%arg0: i32, %arg1: i32, %arg2: memref<8x32xf32, #tpu.memory_space<vmem>>, %arg3: memref<8x1xi32, #tpu.memory_space<vmem>>, %arg4: memref<1x8x128xf32, #tpu.memory_space<vmem>>, %arg5: memref<8x1xf32, #tpu.memory_space<vmem>>, %arg6: memref<8x1xf32, #tpu.memory_space<vmem>>) attributes {dimension_semantics = [#tpu.dimension_semantics<parallel>, #tpu.dimension_semantics<arbitrary>], iteration_bounds = array<i64: 1, 1>, scalar_prefetch = 0 : i64, scratch_operands = 2 : i64, tpu.core_type = #tpu.core_type<tc>, window_params = [{transform_indices = @transform_0, window_bounds = array<i64: 8, 32>}, {transform_indices = @transform_1, window_bounds = array<i64: 8, 1>}, {transform_indices = @transform_2, window_bounds = array<i64: 1, 8, 128>}]} {
    %c0_i32 = arith.constant 0 : i32
    %0 = arith.cmpi eq, %arg1, %c0_i32 : i32
    %1 = arith.extui %0 : i1 to i32
    %c0_i32_0 = arith.constant 0 : i32
    %2 = arith.cmpi ne, %1, %c0_i32_0 : i32
    scf.if %2 {
      %cst_27 = arith.constant 0.000000e+00 : f32
      %63 = vector.broadcast %cst_27 : f32 to vector<8x1xf32>
      %c0_28 = arith.constant 0 : index
      %c0_29 = arith.constant 0 : index
      %64 = vector.load %arg5[%c0_28, %c0_29] : memref<8x1xf32, #tpu.memory_space<vmem>>, vector<8x1xf32>
      tpu.vector_store %arg5[%c0_28, %c0_29], %63 {strides = array<i32>} : memref<8x1xf32, #tpu.memory_space<vmem>>, vector<8x1xf32>,
      %cst_30 = arith.constant 0.000000e+00 : f32
      %65 = vector.broadcast %cst_30 : f32 to vector<8x1xf32>
      %c0_31 = arith.constant 0 : index
      %c0_32 = arith.constant 0 : index
      %66 = vector.load %arg6[%c0_31, %c0_32] : memref<8x1xf32, #tpu.memory_space<vmem>>, vector<8x1xf32>
      tpu.vector_store %arg6[%c0_31, %c0_32], %65 {strides = array<i32>} : memref<8x1xf32, #tpu.memory_space<vmem>>, vector<8x1xf32>,
    } else {
    }
    %c0 = arith.constant 0 : index
    %c0_1 = arith.constant 0 : index
    %3 = vector.load %arg2[%c0, %c0_1] : memref<8x32xf32, #tpu.memory_space<vmem>>, vector<8x32xf32>
    %c0_2 = arith.constant 0 : index
    %c0_3 = arith.constant 0 : index
    %4 = vector.load %arg3[%c0_2, %c0_3] : memref<8x1xi32, #tpu.memory_space<vmem>>, vector<8x1xi32>
    %5 = tpu.iota {dimensions = array<i32: 1>} : vector<8x32xi32>
    %6 = vector.broadcast %4 : vector<8x1xi32> to vector<8x32xi32>
    %7 = arith.cmpi eq, %5, %6 : vector<8x32xi32>
    %cst = arith.constant 0.000000e+00 : f32
    %8 = vector.broadcast %cst : f32 to vector<8x32xf32>
    %9 = arith.select %7, %3, %8 : vector<8x32xi1>, vector<8x32xf32>
    %cst_4 = arith.constant dense<0.000000e+00> : vector<8xf32>
    %10 = vector.multi_reduction <add>, %9, %cst_4 [1] : vector<8x32xf32> to vector<8xf32>
    %11 = vector.shape_cast %10 : vector<8xf32> to vector<8x1xf32>
    %cst_5 = arith.constant dense<0xFF800000> : vector<8xf32>
    %12 = vector.multi_reduction <maximumf>, %3, %cst_5 [1] : vector<8x32xf32> to vector<8xf32>
    %13 = vector.shape_cast %12 : vector<8xf32> to vector<8x1xf32>
    %14 = vector.broadcast %13 : vector<8x1xf32> to vector<8x32xf32>
    %15 = arith.subf %3, %14 : vector<8x32xf32>
    %16 = math.exp %15 : vector<8x32xf32>
    %cst_6 = arith.constant dense<0.000000e+00> : vector<8xf32>
    %17 = vector.multi_reduction <add>, %16, %cst_6 [1] : vector<8x32xf32> to vector<8xf32>
    %18 = vector.shape_cast %17 : vector<8xf32> to vector<8x1xf32>
    %19 = arith.mulf %16, %3 : vector<8x32xf32>
    %cst_7 = arith.constant dense<0.000000e+00> : vector<8xf32>
    %20 = vector.multi_reduction <add>, %19, %cst_7 [1] : vector<8x32xf32> to vector<8xf32>
    %21 = vector.shape_cast %20 : vector<8xf32> to vector<8x1xf32>
    %22 = arith.divf %21, %18 : vector<8x1xf32>
    %23 = arith.subf %22, %11 : vector<8x1xf32>
    %24 = tpu.iota {dimensions = array<i32: 0>} : vector<8x1xi32>
    %c1_i32 = arith.constant 1 : i32
    %25 = arith.muli %arg0, %c1_i32 : i32
    %26 = arith.addi %25, %arg1 : i32
    %c8_i32 = arith.constant 8 : i32
    %27 = arith.muli %26, %c8_i32 : i32
    %28 = vector.broadcast %27 : i32 to vector<8x1xi32>
    %29 = arith.addi %28, %24 : vector<8x1xi32>
    %c8_i32_8 = arith.constant 8 : i32
    %30 = vector.broadcast %c8_i32_8 : i32 to vector<8x1xi32>
    %31 = arith.cmpi slt, %29, %30 : vector<8x1xi32>
    %cst_9 = arith.constant 0.000000e+00 : f32
    %32 = vector.broadcast %cst_9 : f32 to vector<8x1xf32>
    %33 = arith.select %31, %23, %32 : vector<8x1xi1>, vector<8x1xf32>
    %c0_10 = arith.constant 0 : index
    %c0_11 = arith.constant 0 : index
    %34 = vector.load %arg5[%c0_10, %c0_11] : memref<8x1xf32, #tpu.memory_space<vmem>>, vector<8x1xf32>
    %c2_i32 = arith.constant 2 : i32
    %c0_i32_12 = arith.constant 0 : i32
    %35 = arith.cmpi eq, %c2_i32, %c0_i32_12 : i32
    %c1_i32_13 = arith.constant 1 : i32
    %36 = arith.select %35, %c1_i32_13, %c2_i32 : i32
    %37 = vector.broadcast %36 : i32 to vector<8x1xi32>
    %38 = arith.remsi %24, %37 : vector<8x1xi32>
    %c0_i32_14 = arith.constant 0 : i32
    %39 = vector.broadcast %c0_i32_14 : i32 to vector<8x1xi32>
    %40 = arith.cmpi ne, %38, %39 : vector<8x1xi32>
    %c0_i32_15 = arith.constant 0 : i32
    %41 = vector.broadcast %c0_i32_15 : i32 to vector<8x1xi32>
    %42 = arith.cmpi slt, %38, %41 : vector<8x1xi32>
    %c0_i32_16 = arith.constant 0 : i32
    %43 = arith.cmpi slt, %36, %c0_i32_16 : i32
    %44 = vector.broadcast %43 : i1 to vector<8x1xi1>
    %45 = vector.broadcast %44 : vector<8x1xi1> to vector<8x1xi1>
    %46 = arith.xori %42, %45 : vector<8x1xi1>
    %47 = arith.andi %46, %40 : vector<8x1xi1>
    %48 = vector.broadcast %36 : i32 to vector<8x1xi32>
    %49 = arith.addi %38, %48 : vector<8x1xi32>
    %50 = arith.select %47, %49, %38 : vector<8x1xi1>, vector<8x1xi32>
    %c0_i32_17 = arith.constant 0 : i32
    %51 = vector.broadcast %c0_i32_17 : i32 to vector<8x1xi32>
    %52 = arith.cmpi eq, %50, %51 : vector<8x1xi32>
    %cst_18 = arith.constant 0.000000e+00 : f32
    %53 = vector.broadcast %cst_18 : f32 to vector<8x1xf32>
    %54 = arith.select %52, %33, %53 : vector<8x1xi1>, vector<8x1xf32>
    %55 = arith.addf %34, %54 : vector<8x1xf32>
    %c0_19 = arith.constant 0 : index
    %c0_20 = arith.constant 0 : index
    %56 = vector.load %arg5[%c0_19, %c0_20] : memref<8x1xf32, #tpu.memory_space<vmem>>, vector<8x1xf32>
    tpu.vector_store %arg5[%c0_19, %c0_20], %55 {strides = array<i32>} : memref<8x1xf32, #tpu.memory_space<vmem>>, vector<8x1xf32>,
    %c0_21 = arith.constant 0 : index
    %c0_22 = arith.constant 0 : index
    %57 = vector.load %arg6[%c0_21, %c0_22] : memref<8x1xf32, #tpu.memory_space<vmem>>, vector<8x1xf32>
    %58 = arith.addf %57, %33 : vector<8x1xf32>
    %c0_23 = arith.constant 0 : index
    %c0_24 = arith.constant 0 : index
    %59 = vector.load %arg6[%c0_23, %c0_24] : memref<8x1xf32, #tpu.memory_space<vmem>>, vector<8x1xf32>
    tpu.vector_store %arg6[%c0_23, %c0_24], %58 {strides = array<i32>} : memref<8x1xf32, #tpu.memory_space<vmem>>, vector<8x1xf32>,
    %c0_i32_25 = arith.constant 0 : i32
    %60 = arith.cmpi eq, %arg1, %c0_i32_25 : i32
    %61 = arith.extui %60 : i1 to i32
    %c0_i32_26 = arith.constant 0 : i32
    %62 = arith.cmpi ne, %61, %c0_i32_26 : i32
    scf.if %62 {
      %c0_27 = arith.constant 0 : index
      %c0_28 = arith.constant 0 : index
      %63 = vector.load %arg5[%c0_27, %c0_28] : memref<8x1xf32, #tpu.memory_space<vmem>>, vector<8x1xf32>
      %64 = vector.shape_cast %63 : vector<8x1xf32> to vector<1x8x1xf32>
      %cst_29 = arith.constant dense<0.000000e+00> : vector<1xf32>
      %65 = vector.multi_reduction <add>, %64, %cst_29 [1, 2] : vector<1x8x1xf32> to vector<1xf32>
      %66 = vector.shape_cast %65 : vector<1xf32> to vector<1x1x1xf32>
      %67 = vector.extract %66[0, 0, 0] : f32 from vector<1x1x1xf32>
      %c0_30 = arith.constant 0 : index
      %c0_31 = arith.constant 0 : index
      %68 = vector.load %arg6[%c0_30, %c0_31] : memref<8x1xf32, #tpu.memory_space<vmem>>, vector<8x1xf32>
      %69 = vector.shape_cast %68 : vector<8x1xf32> to vector<1x8x1xf32>
      %cst_32 = arith.constant dense<0.000000e+00> : vector<1xf32>
      %70 = vector.multi_reduction <add>, %69, %cst_32 [1, 2] : vector<1x8x1xf32> to vector<1xf32>
      %71 = vector.shape_cast %70 : vector<1xf32> to vector<1x1x1xf32>
      %72 = vector.extract %71[0, 0, 0] : f32 from vector<1x1x1xf32>
      %73 = arith.subf %72, %67 : f32
      %74 = tpu.iota {dimensions = array<i32: 1>} : vector<1x8x128xi32>
      %c0_i32_33 = arith.constant 0 : i32
      %75 = vector.broadcast %c0_i32_33 : i32 to vector<1x8x128xi32>
      %76 = arith.cmpi eq, %74, %75 : vector<1x8x128xi32>
      %c1_i32_34 = arith.constant 1 : i32
      %77 = vector.broadcast %c1_i32_34 : i32 to vector<1x8x128xi32>
      %78 = arith.cmpi eq, %74, %77 : vector<1x8x128xi32>
      %cst_35 = arith.constant 0.000000e+00 : f32
      %79 = vector.broadcast %73 : f32 to vector<1x8x128xf32>
      %80 = vector.broadcast %cst_35 : f32 to vector<1x8x128xf32>
      %81 = arith.select %78, %79, %80 : vector<1x8x128xi1>, vector<1x8x128xf32>
      %82 = vector.broadcast %67 : f32 to vector<1x8x128xf32>
      %83 = arith.select %76, %82, %81 : vector<1x8x128xi1>, vector<1x8x128xf32>
      %c0_36 = arith.constant 0 : index
      %c0_37 = arith.constant 0 : index
      %c0_38 = arith.constant 0 : index
      %84 = vector.load %arg4[%c0_36, %c0_37, %c0_38] : memref<1x8x128xf32, #tpu.memory_space<vmem>>, vector<1x8x128xf32>
      tpu.vector_store %arg4[%c0_36, %c0_37, %c0_38], %83 {strides = array<i32>} : memref<1x8x128xf32, #tpu.memory_space<vmem>>, vector<1x8x128xf32>,
    } else {
    }
    return
  }
  func.func @transform_0(%arg0: i32, %arg1: i32) -> (i32, i32) {
    %c1_i32 = arith.constant 1 : i32
    %0 = arith.muli %arg0, %c1_i32 : i32
    %1 = arith.addi %0, %arg1 : i32
    %c0_i32 = arith.constant 0 : i32
    %2 = arith.minsi %1, %c0_i32 : i32
    %c0_i32_0 = arith.constant 0 : i32
    %c0_i32_1 = arith.constant 0 : i32
    return %2, %c0_i32_0 : i32, i32
  }
  func.func @transform_1(%arg0: i32, %arg1: i32) -> (i32, i32) {
    %c1_i32 = arith.constant 1 : i32
    %0 = arith.muli %arg0, %c1_i32 : i32
    %1 = arith.addi %0, %arg1 : i32
    %c0_i32 = arith.constant 0 : i32
    %2 = arith.minsi %1, %c0_i32 : i32
    %c0_i32_0 = arith.constant 0 : i32
    %c0_i32_1 = arith.constant 0 : i32
    return %2, %c0_i32_0 : i32, i32
  }
  func.func @transform_2(%arg0: i32, %arg1: i32) -> (i32, i32, i32) {
    %c0_i32 = arith.constant 0 : i32
    %c0_i32_0 = arith.constant 0 : i32
    %c0_i32_1 = arith.constant 0 : i32
    return %arg0, %c0_i32, %c0_i32_0 : i32, i32, i32
  }
}

</mosaic_0001>

<bundles_post_ra>
// kernel: tpu_custom_call.1
= control target key start
LH: loop header
LB: loop body
LE: loop exit
PB: predicated region body
PF: predicated region fallthrough
CT: control target
= control target key end

     0   :  { %vm82_vm0 = vcmask 261120   ;;  %s280_s0 = inlined_call_operand.vmem [shape: f32[8,32], index: 0, kind: input, shape index: {}]   ;;  %s281_s1 = inlined_call_operand.vmem [shape: s32[8,1], index: 1, kind: input, shape index: {}]   ;;  %s282_s2 = inlined_call_operand.hbm [shape: f32[1,8,128], index: 2, kind: output, shape index: {}]  }
   0x1   :  { %v73_v0 = vld [vmem:[%s280_s0] sm:$0xff] }
   0x2   :  { %7 = vsyncpa [#allocation5], 0  ;;  %v86_v1 = vsel %vm82_vm0, %v73_v0, -inf  ;;  %v243_v2 = vmov 0   ;;  %v74_v3 = vld [vmem:[%s281_s1] sm:$0xff]  ;;  %v75_v9 = vlaneseq  ;;  %vm70_vm2 = vcmask 7168  }
   0x3   :  { %212 = vset.pattern.permute.xlu0 %v243_v2  ;;  %v244_v16 = vmov 0.0   ;;  %s245_s13 = smov [#allocation4]   ;;  %s184_s18 = sshll.u32 %s282_s2, 4  ;;  %s185_s18 = int_to_ptr.hbm [resolvable:$true] %s184_s18 }
   0x4   :  { %87 = vmax.xlane.f32.xlu0 %v86_v1  ;;  %v76_v11 = vand.u32 127, %v75_v9  ;;  %71 = vst.msk [vmem:[#allocation2] sm:$0xff] %vm70_vm2, %v244_v16  ;;  %v116_v21 = vshrl.u32 %v75_v9, 7  ;;  %s182_s14 = sshll.u32 %s245_s13, 4  ;;  %s183_s14 = int_to_ptr.vmem [resolvable:$true] %s182_s14 }
   0x5   :  { %72 = vst.msk [vmem:[#allocation3] sm:$0xff] %vm70_vm2, %v244_v16 }
   0x6   :  { %v128_v27 = vand.u32 1, %v116_v21  ;;  %vm171_vm8 = vcmp.eq.s32.totalorder %v116_v21, 1  ;;  %vm170_vm9 = vcmp.eq.s32.totalorder %v116_v21, 0 }
   0x8   :  { %vm136_vm7 = vcmp.eq.s32.totalorder %v128_v27, 0 }
   0xb   :  { %v123_v35 = vld [vmem:[#allocation2] sm:$0xff] }
   0xc   :  { %v141_v33 = vld [vmem:[#allocation3] sm:$0xff] }
  0x18   :  { %78 = vperm.xlu0 %212, %v74_v3  }
  0x77   :  { %v88_v4 = vpop.xlane.xlu0 %87 }
  0x78   :  { %v89_v5 = vsub.f32 %v73_v0, %v88_v4 }
  0x7a   :  { %v90_v6 = vmul.f32 1.442695, %v89_v5 }
  0x7c   :  { %213 = vpow2.f32 %v90_v6 }
  0x82   :  { %v214_v7 = vpop.eup %213 }
  0x83   :  { %v92_v8 = vsel %vm82_vm0, %v214_v7, 0.0  ;;  %v95_v10 = vmul.f32 %v214_v7, %v73_v0 }
  0x84   :  { %93 = vadd.xlane.f32.xlu1 %v92_v8 }
  0x85   :  { %v96_v13 = vsel %vm82_vm0, %v95_v10, 0.0 }
  0x8a   :  { %v79_v12 = vpop.permute.xlu0 %78 }
  0x8b   :  { %vm80_vm1 = vcmp.eq.s32.totalorder %v76_v11, %v79_v12 }
  0x8c   :  { %97 = vadd.xlane.f32.xlu1 %v96_v13  ;;  %v81_v14 = vsel %vm80_vm1, %v73_v0, 0.0 }
  0x8d   :  { %v83_v15 = vsel %vm82_vm0, %v81_v14, 0.0 }
  0x8e   :  { %84 = vadd.xlane.f32.xlu2 %v83_v15 }
  0xf7   :  { %v94_v17 = vpop.xlane.xlu1 %93 }
  0xf8   :  { %215 = vrcp.f32 %v94_v17  ;;  %v110_v22 = vand.u32 2147483648, %v94_v17  ;;  %v108_v24 = vand.u32 2147483647, %v94_v17  ;;  %vm104_vm4 = vweird.f32 %v94_v17 }
  0xfa   :  { %v111_v26 = vor.u32 1.1754944e-38, %v110_v22  ;;  %vm109_vm6 = vcmp.eq.f32.partialorder %v108_v24, 8.507059e+37 }
  0xfe   :  { %v216_v18 = vpop.eup %215 }
  0xff   :  { %v100_v19 = vmul.f32 %v216_v18, %v94_v17  ;;  %vm105_vm3 = vweird.f32 %v216_v18  ;;  %v98_v30 = vpop.xlane.xlu1 %97 }
 0x100   :  { %vm106_vm5 = vmor %vm104_vm4, %vm105_vm3 }
 0x101   :  { %v101_v20 = vsub.f32 1.0, %v100_v19  ;;  %v85_v31 = vpop.xlane.xlu2 %84 }
 0x103   :  { %v102_v23 = vmul.f32 %v216_v18, %v101_v20 }
 0x105   :  { %v103_v25 = vadd.f32 %v216_v18, %v102_v23 }
 0x107   :  { %v107_v28 = vsel %vm106_vm5, %v216_v18, %v103_v25 }
 0x108   :  { %v112_v29 = vsel %vm109_vm6, %v111_v26, %v107_v28 }
 0x109   :  { %v113_v32 = vmul.f32 %v112_v29, %v98_v30 }
 0x10b   :  { %v114_v34 = vsub.f32 %v113_v32, %v85_v31 }
 0x10d   :  { %v137_v36 = vsel %vm136_vm7, %v114_v34, 0.0  ;;  %v142_v37 = vadd.f32 %v141_v33, %v114_v34 }
 0x10e   :  { %v138_v38 = vadd.f32 %v137_v36, %v123_v35 }
 0x10f   :  { %143 = vst.msk [vmem:[#allocation3] sm:$0xff] %vm70_vm2, %v142_v37 }
 0x110   :  { %140 = vst.msk [vmem:[#allocation2] sm:$0xff] %vm70_vm2, %v138_v38 }
 0x116   :  { %v158_v39 = vld [vmem:[#allocation3] sm:$0xff] }
 0x117   :  { %v159_v40 = vsel %vm70_vm2, %v158_v39, 0.0  ;;  %v147_v41 = vld [vmem:[#allocation2] sm:$0xff] }
 0x118   :  { %160 = vadd.xlane.f32.xlu1 %v159_v40  ;;  %v148_v42 = vsel %vm70_vm2, %v147_v41, 0.0 }
 0x119   :  { %149 = vadd.xlane.f32.xlu2 %v148_v42 }
 0x18b   :  { %v161_v43 = vpop.xlane.xlu1 %160 }
 0x18c   :  { %v162_v44 = vrot.slane %v161_v43, 4  ;;  %v150_v45 = vpop.xlane.xlu2 %149 }
 0x18d   :  { %v151_v46 = vrot.slane %v150_v45, 4 }
 0x18e   :  { %v163_v47 = vadd.f32 %v162_v44, %v161_v43 }
 0x18f   :  { %v152_v48 = vadd.f32 %v151_v46, %v150_v45 }
 0x190   :  { %v164_v49 = vrot.slane %v163_v47, 2 }
 0x191   :  { %v153_v50 = vrot.slane %v152_v48, 2 }
 0x192   :  { %v165_v51 = vadd.f32 %v164_v49, %v163_v47 }
 0x193   :  { %v154_v52 = vadd.f32 %v153_v50, %v152_v48 }
 0x194   :  { %v166_v53 = vrot.slane %v165_v51, 1 }
 0x195   :  { %v155_v54 = vrot.slane %v154_v52, 1 }
 0x196   :  { %v167_v55 = vadd.f32 %v166_v53, %v165_v51 }
 0x197   :  { %v156_v56 = vadd.f32 %v155_v54, %v154_v52 }
 0x199   :  { %205 = vpush %v156_v56 }
 0x19a   :  { %207 = vpush %v167_v55 }
 0x1ca   :  { %s206_s0 = spop %205 }
 0x1cb   :  { %s208_s1 = spop %207  ;;  %v174_v58 = vstv %s206_s0 }
 0x1cc   :  { %s169_s15 = ssub.f32 %s208_s1, %s206_s0 }
 0x1ce   :  { %v172_v57 = vstv %s169_s15 }
 0x1cf   :  { %v173_v59 = vsel %vm171_vm8, %v172_v57, 0.0 }
 0x1d0   :  { %v175_v60 = vsel %vm170_vm9, %v174_v58, %v173_v59 }
 0x1d1   :  { %176 = vst [vmem:[#allocation4] sm:$0xff] %v175_v60 }
 0x1d2   :  { %187 = dma.vmem_to_hbm [thread:$0]  %s183_s14, 128, %s185_s18, [#allocation5]  }
 0x1d3   :  { %241 = dma.done.wait [#allocation5], 128  }
 0x1d4   :  { %242 = vsyncadd [#allocation5], 4294967168 }
 0x1d5   :  { %192 = vsyncpa [#allocation5], 1 }

</bundles_post_ra>
